<compile_context>
chip_gen: v6e
topology: v6e:2x2x1
jax: 0.10.0
libtpu: 0.0.40
codegen_flags: <defaults>
</compile_context>

<pallas_src>
import numpy as np

import jax
import jax.numpy as jnp
from jax.experimental import pallas as pl
from jax.experimental.pallas import tpu as pltpu

_LANE = 128


# --------------------------------------------------------------------------
# Gaussian kernels (match the PyTorch module exactly)
# --------------------------------------------------------------------------
def get_gaussian_kernel_2d(radius: int = 1, sigma: float = 1.0) -> np.ndarray:
    """2-D kernel identical to the PyTorch module's (used by the reference)."""
    size = 2 * radius + 1
    k = np.zeros((size, size), dtype=np.float64)
    for i in range(size):
        for j in range(size):
            x = i - radius
            y = j - radius
            k[i, j] = np.exp(-0.5 / (sigma ** 2) * (x ** 2 + y ** 2))
    k = k / k.sum()
    return k.astype(np.float32)


def get_gaussian_kernel_1d(radius: int = 1, sigma: float = 1.0) -> np.ndarray:
    """Normalized 1-D kernel; outer(g, g) equals the module's 2-D kernel."""
    xs = np.arange(-radius, radius + 1, dtype=np.float64)
    g = np.exp(-0.5 / (sigma ** 2) * xs ** 2)
    g = g / g.sum()
    return g.astype(np.float32)


# --------------------------------------------------------------------------
# Pallas kernel body (row-fused separable blur)
# --------------------------------------------------------------------------
def make_blur_kernel(w1d: np.ndarray, H: int, W: int):
    """Pallas kernel body with the 1-D taps baked in as scalar constants."""
    K = int(w1d.shape[0])
    Hout, Wout = H - K + 1, W - K + 1
    w = [float(v) for v in w1d]
    symmetric = bool(np.allclose(w1d, w1d[::-1]))

    def _weighted_sum(vals):
        """sum_i w[i] * vals[i], folding symmetric taps (w[i]==w[K-1-i])."""
        acc = None
        if symmetric:
            i, j = 0, K - 1
            while i < j:
                term = w[i] * (vals[i] + vals[j])
                acc = term if acc is None else acc + term
                i += 1
                j -= 1
            if i == j:
                term = w[i] * vals[i]
                acc = term if acc is None else acc + term
        else:
            for i in range(K):
                term = w[i] * vals[i]
                acc = term if acc is None else acc + term
        return acc

    def blur_kernel(x_ref, o_ref):
        # x_ref block: (H, W, TB), o_ref block: (Hout, Wout, TB);
        # lane dim = TB (multiple of 128) -> unmasked, lane-dense access.
        for h in range(Hout):
            # Vertical taps: per-slice f32 cast straight from the input ref
            # (no whole-tile f32 copy).  Each row slice is (W, TB).
            rows = [x_ref[h + i, :, :].astype(jnp.float32) for i in range(K)]
            tmp = _weighted_sum(rows)                      # (W, TB) f32

            # Horizontal taps along W (shifted static slices of one live row).
            cols = [tmp[dj:dj + Wout, :] for dj in range(K)]
            out_row = _weighted_sum(cols)                  # (Wout, TB) f32

            # One lane-dense store per output row.
            o_ref[h, :, :] = out_row.astype(o_ref.dtype)

    return blur_kernel, Hout, Wout


# --------------------------------------------------------------------------
# Tiling heuristics
# --------------------------------------------------------------------------
_SINGLE_TC_KINDS = ("v5 lite", "v5e", "v5litepod", "v6 lite", "v6e")


def _num_tensorcores() -> int:
    """1 for single-TC chips (v5e/v6e); 2 (conservative) otherwise (v7x...)."""
    try:
        kind = jax.devices()[0].device_kind.lower()
    except Exception:
        return 2
    for s in _SINGLE_TC_KINDS:
        if s in kind:
            return 1
    return 2


def _choose_tb_lanes(H, W, Hout, Wout, n_lanes, in_itemsize, out_itemsize,
                     num_tc) -> int:
    """Pick lanes-of-128 per step: divisor of n_lanes//128, VMEM-budgeted."""
    lanes_total = n_lanes // _LANE
    # Double-buffered in + out tiles per plane (f32 temporaries are now only a
    # few vregs per row thanks to row fusion, covered by headroom).
    bytes_per_plane = 2 * (H * W * in_itemsize + Hout * Wout * out_itemsize)
    budget = 24 * 1024 * 1024                      # safe for v7x scoped VMEM
    budget_lanes = max(1, budget // (bytes_per_plane * _LANE))
    # Smaller cap on 2-TC chips (v7x has only 64 MiB physical VMEM); bigger on
    # single-TC v5e/v6e where fewer, larger steps cut fixed per-step overhead.
    cap_lanes = 8 if num_tc >= 2 else 16
    max_lanes = max(1, min(lanes_total, budget_lanes, cap_lanes))

    # Largest divisor of lanes_total that fits -> no padded zero planes.
    tb_lanes = 1
    for d in range(max_lanes, 0, -1):
        if lanes_total % d == 0:
            tb_lanes = d
            break

    # On 2-TC chips prefer an even step count so neither core idles on a tail.
    if num_tc >= 2 and lanes_total > 1:
        steps = lanes_total // tb_lanes
        if steps % 2 == 1:
            for d in range(tb_lanes, 0, -1):
                if lanes_total % d == 0 and (lanes_total // d) % 2 == 0:
                    tb_lanes = d
                    break
    return tb_lanes


# --------------------------------------------------------------------------
# Forward pass
# --------------------------------------------------------------------------
def gaussian_blur(x: jax.Array, radius: int = 1, sigma: float = 1.0) -> jax.Array:
    """Forward pass matching Gaussian_bluring.forward (valid conv, padding=0)."""
    w1d = get_gaussian_kernel_1d(radius, sigma)
    H, W = int(x.shape[-2]), int(x.shape[-1])
    lead = tuple(x.shape[:-2])
    N = 1
    for d in lead:
        N *= int(d)

    kernel, Hout, Wout = make_blur_kernel(w1d, H, W)

    n_lanes = -(-N // _LANE) * _LANE
    in_itemsize = jnp.dtype(x.dtype).itemsize
    out_itemsize = in_itemsize
    num_tc = _num_tensorcores()
    tb_lanes = _choose_tb_lanes(H, W, Hout, Wout, n_lanes,
                                in_itemsize, out_itemsize, num_tc)
    TB = tb_lanes * _LANE
    steps = n_lanes // TB

    # Explicit scoped-VMEM limit: double-buffered tiles + headroom for spills.
    tile_bytes = 2 * TB * (H * W * in_itemsize + Hout * Wout * out_itemsize)
    vmem_limit = int(min(max(tile_bytes + (8 << 20), 32 << 20), 48 << 20))

    # (lead..., H, W) -> (N, H, W); pad the cheap leading axis, then put the
    # batch axis on lanes: (H, W, n_lanes).
    x_flat = x.reshape((N, H, W))
    if n_lanes != N:
        x_flat = jnp.pad(x_flat, ((0, n_lanes - N), (0, 0), (0, 0)))
    x_t = jnp.transpose(x_flat, (1, 2, 0))

    out_t = pl.pallas_call(
        kernel,
        out_shape=jax.ShapeDtypeStruct((Hout, Wout, n_lanes), x.dtype),
        grid_spec=pltpu.PrefetchScalarGridSpec(
            num_scalar_prefetch=0,
            grid=(steps,),
            in_specs=[pl.BlockSpec((H, W, TB), lambda i: (0, 0, i))],
            out_specs=pl.BlockSpec((Hout, Wout, TB), lambda i: (0, 0, i)),
        ),
        compiler_params=pltpu.CompilerParams(
            dimension_semantics=("parallel",),
            vmem_limit_bytes=vmem_limit,
        ),
    )(x_t)

    # Drop padding planes, restore (lead..., Hout, Wout).
    out = jnp.transpose(out_t[:, :, :N], (2, 0, 1))
    return out.reshape(lead + (Hout, Wout))


# Jitted entry point so the wrapper pad/transpose/reshape fuse with neighbors.
gaussian_blur_jit = jax.jit(gaussian_blur, static_argnames=("radius", "sigma"))


# --------------------------------------------------------------------------
# Reference + self-test
# --------------------------------------------------------------------------
def _reference_blur(x: jax.Array, radius: int = 1, sigma: float = 1.0) -> jax.Array:
    """Pure-JAX reference (lax.conv with the full 2-D kernel)."""
    weights = jnp.asarray(get_gaussian_kernel_2d(radius, sigma))
    H, W = x.shape[-2], x.shape[-1]
    lead = x.shape[:-2]
    x_flat = x.reshape((-1, 1, H, W)).astype(jnp.float32)
    w = weights.reshape(1, 1, weights.shape[0], weights.shape[1])
    y = jax.lax.conv_general_dilated(
        x_flat, w, window_strides=(1, 1), padding="VALID",
        dimension_numbers=("NCHW", "OIHW", "NCHW"))
    return y.reshape(lead + y.shape[-2:]).astype(x.dtype)


if __name__ == "__main__":
    key = jax.random.PRNGKey(0)
    B, C, H, W = 2, 4, 16, 16
    x = jax.random.normal(key, (B, C, H, W), dtype=jnp.float32)

    out = gaussian_blur_jit(x, radius=1, sigma=1.0)
    out = jax.block_until_ready(out)

    ref = _reference_blur(x, radius=1, sigma=1.0)
    assert out.shape == (B, C, H - 2, W - 2), out.shape
    assert bool(jnp.allclose(out, ref, atol=1e-5, rtol=1e-5)), \
        "Pallas output does not match reference conv"

    print("KERNEL_OK")
</pallas_src>

<mosaic_0001>
module attributes {stable_mosaic.version = 11 : i64} {
  func.func @blur_kernel(%arg0: i32, %arg1: memref<16x16x128xf32, #tpu.memory_space<vmem>>, %arg2: memref<14x14x128xf32, #tpu.memory_space<vmem>>) attributes {dimension_semantics = [#tpu.dimension_semantics<parallel>], iteration_bounds = array<i64: 1>, scalar_prefetch = 0 : i64, scratch_operands = 0 : i64, tpu.core_type = #tpu.core_type<tc>, window_params = [{transform_indices = @transform_0, window_bounds = array<i64: 16, 16, 128>}, {transform_indices = @transform_1, window_bounds = array<i64: 14, 14, 128>}]} {
    %c0 = arith.constant 0 : index
    %c0_0 = arith.constant 0 : index
    %c0_1 = arith.constant 0 : index
    %0 = vector.load %arg1[%c0, %c0_0, %c0_1] : memref<16x16x128xf32, #tpu.memory_space<vmem>>, vector<1x16x128xf32>
    %1 = vector.shape_cast %0 : vector<1x16x128xf32> to vector<16x128xf32>
    %c1 = arith.constant 1 : index
    %c0_2 = arith.constant 0 : index
    %c0_3 = arith.constant 0 : index
    %2 = vector.load %arg1[%c1, %c0_2, %c0_3] : memref<16x16x128xf32, #tpu.memory_space<vmem>>, vector<1x16x128xf32>
    %3 = vector.shape_cast %2 : vector<1x16x128xf32> to vector<16x128xf32>
    %c2 = arith.constant 2 : index
    %c0_4 = arith.constant 0 : index
    %c0_5 = arith.constant 0 : index
    %4 = vector.load %arg1[%c2, %c0_4, %c0_5] : memref<16x16x128xf32, #tpu.memory_space<vmem>>, vector<1x16x128xf32>
    %5 = vector.shape_cast %4 : vector<1x16x128xf32> to vector<16x128xf32>
    %6 = arith.addf %1, %5 : vector<16x128xf32>
    %cst = arith.constant 0.274068624 : f32
    %7 = vector.broadcast %cst : f32 to vector<16x128xf32>
    %8 = arith.mulf %7, %6 : vector<16x128xf32>
    %cst_6 = arith.constant 0.451862752 : f32
    %9 = vector.broadcast %cst_6 : f32 to vector<16x128xf32>
    %10 = arith.mulf %9, %3 : vector<16x128xf32>
    %11 = arith.addf %8, %10 : vector<16x128xf32>
    %12 = vector.extract_strided_slice %11 {offsets = [0, 0], sizes = [14, 128], strides = [1, 1]} : vector<16x128xf32> to vector<14x128xf32>
    %13 = vector.extract_strided_slice %11 {offsets = [1, 0], sizes = [14, 128], strides = [1, 1]} : vector<16x128xf32> to vector<14x128xf32>
    %14 = vector.extract_strided_slice %11 {offsets = [2, 0], sizes = [14, 128], strides = [1, 1]} : vector<16x128xf32> to vector<14x128xf32>
    %15 = arith.addf %12, %14 : vector<14x128xf32>
    %cst_7 = arith.constant 0.274068624 : f32
    %16 = vector.broadcast %cst_7 : f32 to vector<14x128xf32>
    %17 = arith.mulf %16, %15 : vector<14x128xf32>
    %cst_8 = arith.constant 0.451862752 : f32
    %18 = vector.broadcast %cst_8 : f32 to vector<14x128xf32>
    %19 = arith.mulf %18, %13 : vector<14x128xf32>
    %20 = arith.addf %17, %19 : vector<14x128xf32>
    %c0_9 = arith.constant 0 : index
    %c0_10 = arith.constant 0 : index
    %c0_11 = arith.constant 0 : index
    %21 = vector.load %arg2[%c0_9, %c0_10, %c0_11] : memref<14x14x128xf32, #tpu.memory_space<vmem>>, vector<1x14x128xf32>
    %22 = vector.shape_cast %21 : vector<1x14x128xf32> to vector<14x128xf32>
    %23 = vector.shape_cast %20 : vector<14x128xf32> to vector<1x14x128xf32>
    tpu.vector_store %arg2[%c0_9, %c0_10, %c0_11], %23 {strides = array<i32>} : memref<14x14x128xf32, #tpu.memory_space<vmem>>, vector<1x14x128xf32>,
    %c1_12 = arith.constant 1 : index
    %c0_13 = arith.constant 0 : index
    %c0_14 = arith.constant 0 : index
    %24 = vector.load %arg1[%c1_12, %c0_13, %c0_14] : memref<16x16x128xf32, #tpu.memory_space<vmem>>, vector<1x16x128xf32>
    %25 = vector.shape_cast %24 : vector<1x16x128xf32> to vector<16x128xf32>
    %c2_15 = arith.constant 2 : index
    %c0_16 = arith.constant 0 : index
    %c0_17 = arith.constant 0 : index
    %26 = vector.load %arg1[%c2_15, %c0_16, %c0_17] : memref<16x16x128xf32, #tpu.memory_space<vmem>>, vector<1x16x128xf32>
    %27 = vector.shape_cast %26 : vector<1x16x128xf32> to vector<16x128xf32>
    %c3 = arith.constant 3 : index
    %c0_18 = arith.constant 0 : index
    %c0_19 = arith.constant 0 : index
    %28 = vector.load %arg1[%c3, %c0_18, %c0_19] : memref<16x16x128xf32, #tpu.memory_space<vmem>>, vector<1x16x128xf32>
    %29 = vector.shape_cast %28 : vector<1x16x128xf32> to vector<16x128xf32>
    %30 = arith.addf %25, %29 : vector<16x128xf32>
    %cst_20 = arith.constant 0.274068624 : f32
    %31 = vector.broadcast %cst_20 : f32 to vector<16x128xf32>
    %32 = arith.mulf %31, %30 : vector<16x128xf32>
    %cst_21 = arith.constant 0.451862752 : f32
    %33 = vector.broadcast %cst_21 : f32 to vector<16x128xf32>
    %34 = arith.mulf %33, %27 : vector<16x128xf32>
    %35 = arith.addf %32, %34 : vector<16x128xf32>
    %36 = vector.extract_strided_slice %35 {offsets = [0, 0], sizes = [14, 128], strides = [1, 1]} : vector<16x128xf32> to vector<14x128xf32>
    %37 = vector.extract_strided_slice %35 {offsets = [1, 0], sizes = [14, 128], strides = [1, 1]} : vector<16x128xf32> to vector<14x128xf32>
    %38 = vector.extract_strided_slice %35 {offsets = [2, 0], sizes = [14, 128], strides = [1, 1]} : vector<16x128xf32> to vector<14x128xf32>
    %39 = arith.addf %36, %38 : vector<14x128xf32>
    %cst_22 = arith.constant 0.274068624 : f32
    %40 = vector.broadcast %cst_22 : f32 to vector<14x128xf32>
    %41 = arith.mulf %40, %39 : vector<14x128xf32>
    %cst_23 = arith.constant 0.451862752 : f32
    %42 = vector.broadcast %cst_23 : f32 to vector<14x128xf32>
    %43 = arith.mulf %42, %37 : vector<14x128xf32>
    %44 = arith.addf %41, %43 : vector<14x128xf32>
    %c1_24 = arith.constant 1 : index
    %c0_25 = arith.constant 0 : index
    %c0_26 = arith.constant 0 : index
    %45 = vector.load %arg2[%c1_24, %c0_25, %c0_26] : memref<14x14x128xf32, #tpu.memory_space<vmem>>, vector<1x14x128xf32>
    %46 = vector.shape_cast %45 : vector<1x14x128xf32> to vector<14x128xf32>
    %47 = vector.shape_cast %44 : vector<14x128xf32> to vector<1x14x128xf32>
    tpu.vector_store %arg2[%c1_24, %c0_25, %c0_26], %47 {strides = array<i32>} : memref<14x14x128xf32, #tpu.memory_space<vmem>>, vector<1x14x128xf32>,
    %c2_27 = arith.constant 2 : index
    %c0_28 = arith.constant 0 : index
    %c0_29 = arith.constant 0 : index
    %48 = vector.load %arg1[%c2_27, %c0_28, %c0_29] : memref<16x16x128xf32, #tpu.memory_space<vmem>>, vector<1x16x128xf32>
    %49 = vector.shape_cast %48 : vector<1x16x128xf32> to vector<16x128xf32>
    %c3_30 = arith.constant 3 : index
    %c0_31 = arith.constant 0 : index
    %c0_32 = arith.constant 0 : index
    %50 = vector.load %arg1[%c3_30, %c0_31, %c0_32] : memref<16x16x128xf32, #tpu.memory_space<vmem>>, vector<1x16x128xf32>
    %51 = vector.shape_cast %50 : vector<1x16x128xf32> to vector<16x128xf32>
    %c4 = arith.constant 4 : index
    %c0_33 = arith.constant 0 : index
    %c0_34 = arith.constant 0 : index
    %52 = vector.load %arg1[%c4, %c0_33, %c0_34] : memref<16x16x128xf32, #tpu.memory_space<vmem>>, vector<1x16x128xf32>
    %53 = vector.shape_cast %52 : vector<1x16x128xf32> to vector<16x128xf32>
    %54 = arith.addf %49, %53 : vector<16x128xf32>
    %cst_35 = arith.constant 0.274068624 : f32
    %55 = vector.broadcast %cst_35 : f32 to vector<16x128xf32>
    %56 = arith.mulf %55, %54 : vector<16x128xf32>
    %cst_36 = arith.constant 0.451862752 : f32
    %57 = vector.broadcast %cst_36 : f32 to vector<16x128xf32>
    %58 = arith.mulf %57, %51 : vector<16x128xf32>
    %59 = arith.addf %56, %58 : vector<16x128xf32>
    %60 = vector.extract_strided_slice %59 {offsets = [0, 0], sizes = [14, 128], strides = [1, 1]} : vector<16x128xf32> to vector<14x128xf32>
    %61 = vector.extract_strided_slice %59 {offsets = [1, 0], sizes = [14, 128], strides = [1, 1]} : vector<16x128xf32> to vector<14x128xf32>
    %62 = vector.extract_strided_slice %59 {offsets = [2, 0], sizes = [14, 128], strides = [1, 1]} : vector<16x128xf32> to vector<14x128xf32>
    %63 = arith.addf %60, %62 : vector<14x128xf32>
    %cst_37 = arith.constant 0.274068624 : f32
    %64 = vector.broadcast %cst_37 : f32 to vector<14x128xf32>
    %65 = arith.mulf %64, %63 : vector<14x128xf32>
    %cst_38 = arith.constant 0.451862752 : f32
    %66 = vector.broadcast %cst_38 : f32 to vector<14x128xf32>
    %67 = arith.mulf %66, %61 : vector<14x128xf32>
    %68 = arith.addf %65, %67 : vector<14x128xf32>
    %c2_39 = arith.constant 2 : index
    %c0_40 = arith.constant 0 : index
    %c0_41 = arith.constant 0 : index
    %69 = vector.load %arg2[%c2_39, %c0_40, %c0_41] : memref<14x14x128xf32, #tpu.memory_space<vmem>>, vector<1x14x128xf32>
    %70 = vector.shape_cast %69 : vector<1x14x128xf32> to vector<14x128xf32>
    %71 = vector.shape_cast %68 : vector<14x128xf32> to vector<1x14x128xf32>
    tpu.vector_store %arg2[%c2_39, %c0_40, %c0_41], %71 {strides = array<i32>} : memref<14x14x128xf32, #tpu.memory_space<vmem>>, vector<1x14x128xf32>,
    %c3_42 = arith.constant 3 : index
    %c0_43 = arith.constant 0 : index
    %c0_44 = arith.constant 0 : index
    %72 = vector.load %arg1[%c3_42, %c0_43, %c0_44] : memref<16x16x128xf32, #tpu.memory_space<vmem>>, vector<1x16x128xf32>
    %73 = vector.shape_cast %72 : vector<1x16x128xf32> to vector<16x128xf32>
    %c4_45 = arith.constant 4 : index
    %c0_46 = arith.constant 0 : index
    %c0_47 = arith.constant 0 : index
    %74 = vector.load %arg1[%c4_45, %c0_46, %c0_47] : memref<16x16x128xf32, #tpu.memory_space<vmem>>, vector<1x16x128xf32>
    %75 = vector.shape_cast %74 : vector<1x16x128xf32> to vector<16x128xf32>
    %c5 = arith.constant 5 : index
    %c0_48 = arith.constant 0 : index
    %c0_49 = arith.constant 0 : index
    %76 = vector.load %arg1[%c5, %c0_48, %c0_49] : memref<16x16x128xf32, #tpu.memory_space<vmem>>, vector<1x16x128xf32>
    %77 = vector.shape_cast %76 : vector<1x16x128xf32> to vector<16x128xf32>
    %78 = arith.addf %73, %77 : vector<16x128xf32>
    %cst_50 = arith.constant 0.274068624 : f32
    %79 = vector.broadcast %cst_50 : f32 to vector<16x128xf32>
    %80 = arith.mulf %79, %78 : vector<16x128xf32>
    %cst_51 = arith.constant 0.451862752 : f32
    %81 = vector.broadcast %cst_51 : f32 to vector<16x128xf32>
    %82 = arith.mulf %81, %75 : vector<16x128xf32>
    %83 = arith.addf %80, %82 : vector<16x128xf32>
    %84 = vector.extract_strided_slice %83 {offsets = [0, 0], sizes = [14, 128], strides = [1, 1]} : vector<16x128xf32> to vector<14x128xf32>
    %85 = vector.extract_strided_slice %83 {offsets = [1, 0], sizes = [14, 128], strides = [1, 1]} : vector<16x128xf32> to vector<14x128xf32>
    %86 = vector.extract_strided_slice %83 {offsets = [2, 0], sizes = [14, 128], strides = [1, 1]} : vector<16x128xf32> to vector<14x128xf32>
    %87 = arith.addf %84, %86 : vector<14x128xf32>
    %cst_52 = arith.constant 0.274068624 : f32
    %88 = vector.broadcast %cst_52 : f32 to vector<14x128xf32>
    %89 = arith.mulf %88, %87 : vector<14x128xf32>
    %cst_53 = arith.constant 0.451862752 : f32
    %90 = vector.broadcast %cst_53 : f32 to vector<14x128xf32>
    %91 = arith.mulf %90, %85 : vector<14x128xf32>
    %92 = arith.addf %89, %91 : vector<14x128xf32>
    %c3_54 = arith.constant 3 : index
    %c0_55 = arith.constant 0 : index
    %c0_56 = arith.constant 0 : index
    %93 = vector.load %arg2[%c3_54, %c0_55, %c0_56] : memref<14x14x128xf32, #tpu.memory_space<vmem>>, vector<1x14x128xf32>
    %94 = vector.shape_cast %93 : vector<1x14x128xf32> to vector<14x128xf32>
    %95 = vector.shape_cast %92 : vector<14x128xf32> to vector<1x14x128xf32>
    tpu.vector_store %arg2[%c3_54, %c0_55, %c0_56], %95 {strides = array<i32>} : memref<14x14x128xf32, #tpu.memory_space<vmem>>, vector<1x14x128xf32>,
    %c4_57 = arith.constant 4 : index
    %c0_58 = arith.constant 0 : index
    %c0_59 = arith.constant 0 : index
    %96 = vector.load %arg1[%c4_57, %c0_58, %c0_59] : memref<16x16x128xf32, #tpu.memory_space<vmem>>, vector<1x16x128xf32>
    %97 = vector.shape_cast %96 : vector<1x16x128xf32> to vector<16x128xf32>
    %c5_60 = arith.constant 5 : index
    %c0_61 = arith.constant 0 : index
    %c0_62 = arith.constant 0 : index
    %98 = vector.load %arg1[%c5_60, %c0_61, %c0_62] : memref<16x16x128xf32, #tpu.memory_space<vmem>>, vector<1x16x128xf32>
    %99 = vector.shape_cast %98 : vector<1x16x128xf32> to vector<16x128xf32>
    %c6 = arith.constant 6 : index
    %c0_63 = arith.constant 0 : index
    %c0_64 = arith.constant 0 : index
    %100 = vector.load %arg1[%c6, %c0_63, %c0_64] : memref<16x16x128xf32, #tpu.memory_space<vmem>>, vector<1x16x128xf32>
    %101 = vector.shape_cast %100 : vector<1x16x128xf32> to vector<16x128xf32>
    %102 = arith.addf %97, %101 : vector<16x128xf32>
    %cst_65 = arith.constant 0.274068624 : f32
    %103 = vector.broadcast %cst_65 : f32 to vector<16x128xf32>
    %104 = arith.mulf %103, %102 : vector<16x128xf32>
    %cst_66 = arith.constant 0.451862752 : f32
    %105 = vector.broadcast %cst_66 : f32 to vector<16x128xf32>
    %106 = arith.mulf %105, %99 : vector<16x128xf32>
    %107 = arith.addf %104, %106 : vector<16x128xf32>
    %108 = vector.extract_strided_slice %107 {offsets = [0, 0], sizes = [14, 128], strides = [1, 1]} : vector<16x128xf32> to vector<14x128xf32>
    %109 = vector.extract_strided_slice %107 {offsets = [1, 0], sizes = [14, 128], strides = [1, 1]} : vector<16x128xf32> to vector<14x128xf32>
    %110 = vector.extract_strided_slice %107 {offsets = [2, 0], sizes = [14, 128], strides = [1, 1]} : vector<16x128xf32> to vector<14x128xf32>
    %111 = arith.addf %108, %110 : vector<14x128xf32>
    %cst_67 = arith.constant 0.274068624 : f32
    %112 = vector.broadcast %cst_67 : f32 to vector<14x128xf32>
    %113 = arith.mulf %112, %111 : vector<14x128xf32>
    %cst_68 = arith.constant 0.451862752 : f32
    %114 = vector.broadcast %cst_68 : f32 to vector<14x128xf32>
    %115 = arith.mulf %114, %109 : vector<14x128xf32>
    %116 = arith.addf %113, %115 : vector<14x128xf32>
    %c4_69 = arith.constant 4 : index
    %c0_70 = arith.constant 0 : index
    %c0_71 = arith.constant 0 : index
    %117 = vector.load %arg2[%c4_69, %c0_70, %c0_71] : memref<14x14x128xf32, #tpu.memory_space<vmem>>, vector<1x14x128xf32>
    %118 = vector.shape_cast %117 : vector<1x14x128xf32> to vector<14x128xf32>
    %119 = vector.shape_cast %116 : vector<14x128xf32> to vector<1x14x128xf32>
    tpu.vector_store %arg2[%c4_69, %c0_70, %c0_71], %119 {strides = array<i32>} : memref<14x14x128xf32, #tpu.memory_space<vmem>>, vector<1x14x128xf32>,
    %c5_72 = arith.constant 5 : index
    %c0_73 = arith.constant 0 : index
    %c0_74 = arith.constant 0 : index
    %120 = vector.load %arg1[%c5_72, %c0_73, %c0_74] : memref<16x16x128xf32, #tpu.memory_space<vmem>>, vector<1x16x128xf32>
    %121 = vector.shape_cast %120 : vector<1x16x128xf32> to vector<16x128xf32>
    %c6_75 = arith.constant 6 : index
    %c0_76 = arith.constant 0 : index
    %c0_77 = arith.constant 0 : index
    %122 = vector.load %arg1[%c6_75, %c0_76, %c0_77] : memref<16x16x128xf32, #tpu.memory_space<vmem>>, vector<1x16x128xf32>
    %123 = vector.shape_cast %122 : vector<1x16x128xf32> to vector<16x128xf32>
    %c7 = arith.constant 7 : index
    %c0_78 = arith.constant 0 : index
    %c0_79 = arith.constant 0 : index
    %124 = vector.load %arg1[%c7, %c0_78, %c0_79] : memref<16x16x128xf32, #tpu.memory_space<vmem>>, vector<1x16x128xf32>
    %125 = vector.shape_cast %124 : vector<1x16x128xf32> to vector<16x128xf32>
    %126 = arith.addf %121, %125 : vector<16x128xf32>
    %cst_80 = arith.constant 0.274068624 : f32
    %127 = vector.broadcast %cst_80 : f32 to vector<16x128xf32>
    %128 = arith.mulf %127, %126 : vector<16x128xf32>
    %cst_81 = arith.constant 0.451862752 : f32
    %129 = vector.broadcast %cst_81 : f32 to vector<16x128xf32>
    %130 = arith.mulf %129, %123 : vector<16x128xf32>
    %131 = arith.addf %128, %130 : vector<16x128xf32>
    %132 = vector.extract_strided_slice %131 {offsets = [0, 0], sizes = [14, 128], strides = [1, 1]} : vector<16x128xf32> to vector<14x128xf32>
    %133 = vector.extract_strided_slice %131 {offsets = [1, 0], sizes = [14, 128], strides = [1, 1]} : vector<16x128xf32> to vector<14x128xf32>
    %134 = vector.extract_strided_slice %131 {offsets = [2, 0], sizes = [14, 128], strides = [1, 1]} : vector<16x128xf32> to vector<14x128xf32>
    %135 = arith.addf %132, %134 : vector<14x128xf32>
    %cst_82 = arith.constant 0.274068624 : f32
    %136 = vector.broadcast %cst_82 : f32 to vector<14x128xf32>
    %137 = arith.mulf %136, %135 : vector<14x128xf32>
    %cst_83 = arith.constant 0.451862752 : f32
    %138 = vector.broadcast %cst_83 : f32 to vector<14x128xf32>
    %139 = arith.mulf %138, %133 : vector<14x128xf32>
    %140 = arith.addf %137, %139 : vector<14x128xf32>
    %c5_84 = arith.constant 5 : index
    %c0_85 = arith.constant 0 : index
    %c0_86 = arith.constant 0 : index
    %141 = vector.load %arg2[%c5_84, %c0_85, %c0_86] : memref<14x14x128xf32, #tpu.memory_space<vmem>>, vector<1x14x128xf32>
    %142 = vector.shape_cast %141 : vector<1x14x128xf32> to vector<14x128xf32>
    %143 = vector.shape_cast %140 : vector<14x128xf32> to vector<1x14x128xf32>
    tpu.vector_store %arg2[%c5_84, %c0_85, %c0_86], %143 {strides = array<i32>} : memref<14x14x128xf32, #tpu.memory_space<vmem>>, vector<1x14x128xf32>,
    %c6_87 = arith.constant 6 : index
    %c0_88 = arith.constant 0 : index
    %c0_89 = arith.constant 0 : index
    %144 = vector.load %arg1[%c6_87, %c0_88, %c0_89] : memref<16x16x128xf32, #tpu.memory_space<vmem>>, vector<1x16x128xf32>
    %145 = vector.shape_cast %144 : vector<1x16x128xf32> to vector<16x128xf32>
    %c7_90 = arith.constant 7 : index
    %c0_91 = arith.constant 0 : index
    %c0_92 = arith.constant 0 : index
    %146 = vector.load %arg1[%c7_90, %c0_91, %c0_92] : memref<16x16x128xf32, #tpu.memory_space<vmem>>, vector<1x16x128xf32>
    %147 = vector.shape_cast %146 : vector<1x16x128xf32> to vector<16x128xf32>
    %c8 = arith.constant 8 : index
    %c0_93 = arith.constant 0 : index
    %c0_94 = arith.constant 0 : index
    %148 = vector.load %arg1[%c8, %c0_93, %c0_94] : memref<16x16x128xf32, #tpu.memory_space<vmem>>, vector<1x16x128xf32>
    %149 = vector.shape_cast %148 : vector<1x16x128xf32> to vector<16x128xf32>
    %150 = arith.addf %145, %149 : vector<16x128xf32>
    %cst_95 = arith.constant 0.274068624 : f32
    %151 = vector.broadcast %cst_95 : f32 to vector<16x128xf32>
    %152 = arith.mulf %151, %150 : vector<16x128xf32>
    %cst_96 = arith.constant 0.451862752 : f32
    %153 = vector.broadcast %cst_96 : f32 to vector<16x128xf32>
    %154 = arith.mulf %153, %147 : vector<16x128xf32>
    %155 = arith.addf %152, %154 : vector<16x128xf32>
    %156 = vector.extract_strided_slice %155 {offsets = [0, 0], sizes = [14, 128], strides = [1, 1]} : vector<16x128xf32> to vector<14x128xf32>
    %157 = vector.extract_strided_slice %155 {offsets = [1, 0], sizes = [14, 128], strides = [1, 1]} : vector<16x128xf32> to vector<14x128xf32>
    %158 = vector.extract_strided_slice %155 {offsets = [2, 0], sizes = [14, 128], strides = [1, 1]} : vector<16x128xf32> to vector<14x128xf32>
    %159 = arith.addf %156, %158 : vector<14x128xf32>
    %cst_97 = arith.constant 0.274068624 : f32
    %160 = vector.broadcast %cst_97 : f32 to vector<14x128xf32>
    %161 = arith.mulf %160, %159 : vector<14x128xf32>
    %cst_98 = arith.constant 0.451862752 : f32
    %162 = vector.broadcast %cst_98 : f32 to vector<14x128xf32>
    %163 = arith.mulf %162, %157 : vector<14x128xf32>
    %164 = arith.addf %161, %163 : vector<14x128xf32>
    %c6_99 = arith.constant 6 : index
    %c0_100 = arith.constant 0 : index
    %c0_101 = arith.constant 0 : index
    %165 = vector.load %arg2[%c6_99, %c0_100, %c0_101] : memref<14x14x128xf32, #tpu.memory_space<vmem>>, vector<1x14x128xf32>
    %166 = vector.shape_cast %165 : vector<1x14x128xf32> to vector<14x128xf32>
    %167 = vector.shape_cast %164 : vector<14x128xf32> to vector<1x14x128xf32>
    tpu.vector_store %arg2[%c6_99, %c0_100, %c0_101], %167 {strides = array<i32>} : memref<14x14x128xf32, #tpu.memory_space<vmem>>, vector<1x14x128xf32>,
    %c7_102 = arith.constant 7 : index
    %c0_103 = arith.constant 0 : index
    %c0_104 = arith.constant 0 : index
    %168 = vector.load %arg1[%c7_102, %c0_103, %c0_104] : memref<16x16x128xf32, #tpu.memory_space<vmem>>, vector<1x16x128xf32>
    %169 = vector.shape_cast %168 : vector<1x16x128xf32> to vector<16x128xf32>
    %c8_105 = arith.constant 8 : index
    %c0_106 = arith.constant 0 : index
    %c0_107 = arith.constant 0 : index
    %170 = vector.load %arg1[%c8_105, %c0_106, %c0_107] : memref<16x16x128xf32, #tpu.memory_space<vmem>>, vector<1x16x128xf32>
    %171 = vector.shape_cast %170 : vector<1x16x128xf32> to vector<16x128xf32>
    %c9 = arith.constant 9 : index
    %c0_108 = arith.constant 0 : index
    %c0_109 = arith.constant 0 : index
    %172 = vector.load %arg1[%c9, %c0_108, %c0_109] : memref<16x16x128xf32, #tpu.memory_space<vmem>>, vector<1x16x128xf32>
    %173 = vector.shape_cast %172 : vector<1x16x128xf32> to vector<16x128xf32>
    %174 = arith.addf %169, %173 : vector<16x128xf32>
    %cst_110 = arith.constant 0.274068624 : f32
    %175 = vector.broadcast %cst_110 : f32 to vector<16x128xf32>
    %176 = arith.mulf %175, %174 : vector<16x128xf32>
    %cst_111 = arith.constant 0.451862752 : f32
    %177 = vector.broadcast %cst_111 : f32 to vector<16x128xf32>
    %178 = arith.mulf %177, %171 : vector<16x128xf32>
    %179 = arith.addf %176, %178 : vector<16x128xf32>
    %180 = vector.extract_strided_slice %179 {offsets = [0, 0], sizes = [14, 128], strides = [1, 1]} : vector<16x128xf32> to vector<14x128xf32>
    %181 = vector.extract_strided_slice %179 {offsets = [1, 0], sizes = [14, 128], strides = [1, 1]} : vector<16x128xf32> to vector<14x128xf32>
    %182 = vector.extract_strided_slice %179 {offsets = [2, 0], sizes = [14, 128], strides = [1, 1]} : vector<16x128xf32> to vector<14x128xf32>
    %183 = arith.addf %180, %182 : vector<14x128xf32>
    %cst_112 = arith.constant 0.274068624 : f32
    %184 = vector.broadcast %cst_112 : f32 to vector<14x128xf32>
    %185 = arith.mulf %184, %183 : vector<14x128xf32>
    %cst_113 = arith.constant 0.451862752 : f32
    %186 = vector.broadcast %cst_113 : f32 to vector<14x128xf32>
    %187 = arith.mulf %186, %181 : vector<14x128xf32>
    %188 = arith.addf %185, %187 : vector<14x128xf32>
    %c7_114 = arith.constant 7 : index
    %c0_115 = arith.constant 0 : index
    %c0_116 = arith.constant 0 : index
    %189 = vector.load %arg2[%c7_114, %c0_115, %c0_116] : memref<14x14x128xf32, #tpu.memory_space<vmem>>, vector<1x14x128xf32>
    %190 = vector.shape_cast %189 : vector<1x14x128xf32> to vector<14x128xf32>
    %191 = vector.shape_cast %188 : vector<14x128xf32> to vector<1x14x128xf32>
    tpu.vector_store %arg2[%c7_114, %c0_115, %c0_116], %191 {strides = array<i32>} : memref<14x14x128xf32, #tpu.memory_space<vmem>>, vector<1x14x128xf32>,
    %c8_117 = arith.constant 8 : index
    %c0_118 = arith.constant 0 : index
    %c0_119 = arith.constant 0 : index
    %192 = vector.load %arg1[%c8_117, %c0_118, %c0_119] : memref<16x16x128xf32, #tpu.memory_space<vmem>>, vector<1x16x128xf32>
    %193 = vector.shape_cast %192 : vector<1x16x128xf32> to vector<16x128xf32>
    %c9_120 = arith.constant 9 : index
    %c0_121 = arith.constant 0 : index
    %c0_122 = arith.constant 0 : index
    %194 = vector.load %arg1[%c9_120, %c0_121, %c0_122] : memref<16x16x128xf32, #tpu.memory_space<vmem>>, vector<1x16x128xf32>
    %195 = vector.shape_cast %194 : vector<1x16x128xf32> to vector<16x128xf32>
    %c10 = arith.constant 10 : index
    %c0_123 = arith.constant 0 : index
    %c0_124 = arith.constant 0 : index
    %196 = vector.load %arg1[%c10, %c0_123, %c0_124] : memref<16x16x128xf32, #tpu.memory_space<vmem>>, vector<1x16x128xf32>
    %197 = vector.shape_cast %196 : vector<1x16x128xf32> to vector<16x128xf32>
    %198 = arith.addf %193, %197 : vector<16x128xf32>
    %cst_125 = arith.constant 0.274068624 : f32
    %199 = vector.broadcast %cst_125 : f32 to vector<16x128xf32>
    %200 = arith.mulf %199, %198 : vector<16x128xf32>
    %cst_126 = arith.constant 0.451862752 : f32
    %201 = vector.broadcast %cst_126 : f32 to vector<16x128xf32>
    %202 = arith.mulf %201, %195 : vector<16x128xf32>
    %203 = arith.addf %200, %202 : vector<16x128xf32>
    %204 = vector.extract_strided_slice %203 {offsets = [0, 0], sizes = [14, 128], strides = [1, 1]} : vector<16x128xf32> to vector<14x128xf32>
    %205 = vector.extract_strided_slice %203 {offsets = [1, 0], sizes = [14, 128], strides = [1, 1]} : vector<16x128xf32> to vector<14x128xf32>
    %206 = vector.extract_strided_slice %203 {offsets = [2, 0], sizes = [14, 128], strides = [1, 1]} : vector<16x128xf32> to vector<14x128xf32>
    %207 = arith.addf %204, %206 : vector<14x128xf32>
    %cst_127 = arith.constant 0.274068624 : f32
    %208 = vector.broadcast %cst_127 : f32 to vector<14x128xf32>
    %209 = arith.mulf %208, %207 : vector<14x128xf32>
    %cst_128 = arith.constant 0.451862752 : f32
    %210 = vector.broadcast %cst_128 : f32 to vector<14x128xf32>
    %211 = arith.mulf %210, %205 : vector<14x128xf32>
    %212 = arith.addf %209, %211 : vector<14x128xf32>
    %c8_129 = arith.constant 8 : index
    %c0_130 = arith.constant 0 : index
    %c0_131 = arith.constant 0 : index
    %213 = vector.load %arg2[%c8_129, %c0_130, %c0_131] : memref<14x14x128xf32, #tpu.memory_space<vmem>>, vector<1x14x128xf32>
    %214 = vector.shape_cast %213 : vector<1x14x128xf32> to vector<14x128xf32>
    %215 = vector.shape_cast %212 : vector<14x128xf32> to vector<1x14x128xf32>
    tpu.vector_store %arg2[%c8_129, %c0_130, %c0_131], %215 {strides = array<i32>} : memref<14x14x128xf32, #tpu.memory_space<vmem>>, vector<1x14x128xf32>,
    %c9_132 = arith.constant 9 : index
    %c0_133 = arith.constant 0 : index
    %c0_134 = arith.constant 0 : index
    %216 = vector.load %arg1[%c9_132, %c0_133, %c0_134] : memref<16x16x128xf32, #tpu.memory_space<vmem>>, vector<1x16x128xf32>
    %217 = vector.shape_cast %216 : vector<1x16x128xf32> to vector<16x128xf32>
    %c10_135 = arith.constant 10 : index
    %c0_136 = arith.constant 0 : index
    %c0_137 = arith.constant 0 : index
    %218 = vector.load %arg1[%c10_135, %c0_136, %c0_137] : memref<16x16x128xf32, #tpu.memory_space<vmem>>, vector<1x16x128xf32>
    %219 = vector.shape_cast %218 : vector<1x16x128xf32> to vector<16x128xf32>
    %c11 = arith.constant 11 : index
    %c0_138 = arith.constant 0 : index
    %c0_139 = arith.constant 0 : index
    %220 = vector.load %arg1[%c11, %c0_138, %c0_139] : memref<16x16x128xf32, #tpu.memory_space<vmem>>, vector<1x16x128xf32>
    %221 = vector.shape_cast %220 : vector<1x16x128xf32> to vector<16x128xf32>
    %222 = arith.addf %217, %221 : vector<16x128xf32>
    %cst_140 = arith.constant 0.274068624 : f32
    %223 = vector.broadcast %cst_140 : f32 to vector<16x128xf32>
    %224 = arith.mulf %223, %222 : vector<16x128xf32>
    %cst_141 = arith.constant 0.451862752 : f32
    %225 = vector.broadcast %cst_141 : f32 to vector<16x128xf32>
    %226 = arith.mulf %225, %219 : vector<16x128xf32>
    %227 = arith.addf %224, %226 : vector<16x128xf32>
    %228 = vector.extract_strided_slice %227 {offsets = [0, 0], sizes = [14, 128], strides = [1, 1]} : vector<16x128xf32> to vector<14x128xf32>
    %229 = vector.extract_strided_slice %227 {offsets = [1, 0], sizes = [14, 128], strides = [1, 1]} : vector<16x128xf32> to vector<14x128xf32>
    %230 = vector.extract_strided_slice %227 {offsets = [2, 0], sizes = [14, 128], strides = [1, 1]} : vector<16x128xf32> to vector<14x128xf32>
    %231 = arith.addf %228, %230 : vector<14x128xf32>
    %cst_142 = arith.constant 0.274068624 : f32
    %232 = vector.broadcast %cst_142 : f32 to vector<14x128xf32>
    %233 = arith.mulf %232, %231 : vector<14x128xf32>
    %cst_143 = arith.constant 0.451862752 : f32
    %234 = vector.broadcast %cst_143 : f32 to vector<14x128xf32>
    %235 = arith.mulf %234, %229 : vector<14x128xf32>
    %236 = arith.addf %233, %235 : vector<14x128xf32>
    %c9_144 = arith.constant 9 : index
    %c0_145 = arith.constant 0 : index
    %c0_146 = arith.constant 0 : index
    %237 = vector.load %arg2[%c9_144, %c0_145, %c0_146] : memref<14x14x128xf32, #tpu.memory_space<vmem>>, vector<1x14x128xf32>
    %238 = vector.shape_cast %237 : vector<1x14x128xf32> to vector<14x128xf32>
    %239 = vector.shape_cast %236 : vector<14x128xf32> to vector<1x14x128xf32>
    tpu.vector_store %arg2[%c9_144, %c0_145, %c0_146], %239 {strides = array<i32>} : memref<14x14x128xf32, #tpu.memory_space<vmem>>, vector<1x14x128xf32>,
    %c10_147 = arith.constant 10 : index
    %c0_148 = arith.constant 0 : index
    %c0_149 = arith.constant 0 : index
    %240 = vector.load %arg1[%c10_147, %c0_148, %c0_149] : memref<16x16x128xf32, #tpu.memory_space<vmem>>, vector<1x16x128xf32>
    %241 = vector.shape_cast %240 : vector<1x16x128xf32> to vector<16x128xf32>
    %c11_150 = arith.constant 11 : index
    %c0_151 = arith.constant 0 : index
    %c0_152 = arith.constant 0 : index
    %242 = vector.load %arg1[%c11_150, %c0_151, %c0_152] : memref<16x16x128xf32, #tpu.memory_space<vmem>>, vector<1x16x128xf32>
    %243 = vector.shape_cast %242 : vector<1x16x128xf32> to vector<16x128xf32>
    %c12 = arith.constant 12 : index
    %c0_153 = arith.constant 0 : index
    %c0_154 = arith.constant 0 : index
    %244 = vector.load %arg1[%c12, %c0_153, %c0_154] : memref<16x16x128xf32, #tpu.memory_space<vmem>>, vector<1x16x128xf32>
    %245 = vector.shape_cast %244 : vector<1x16x128xf32> to vector<16x128xf32>
    %246 = arith.addf %241, %245 : vector<16x128xf32>
    %cst_155 = arith.constant 0.274068624 : f32
    %247 = vector.broadcast %cst_155 : f32 to vector<16x128xf32>
    %248 = arith.mulf %247, %246 : vector<16x128xf32>
    %cst_156 = arith.constant 0.451862752 : f32
    %249 = vector.broadcast %cst_156 : f32 to vector<16x128xf32>
    %250 = arith.mulf %249, %243 : vector<16x128xf32>
    %251 = arith.addf %248, %250 : vector<16x128xf32>
    %252 = vector.extract_strided_slice %251 {offsets = [0, 0], sizes = [14, 128], strides = [1, 1]} : vector<16x128xf32> to vector<14x128xf32>
    %253 = vector.extract_strided_slice %251 {offsets = [1, 0], sizes = [14, 128], strides = [1, 1]} : vector<16x128xf32> to vector<14x128xf32>
    %254 = vector.extract_strided_slice %251 {offsets = [2, 0], sizes = [14, 128], strides = [1, 1]} : vector<16x128xf32> to vector<14x128xf32>
    %255 = arith.addf %252, %254 : vector<14x128xf32>
    %cst_157 = arith.constant 0.274068624 : f32
    %256 = vector.broadcast %cst_157 : f32 to vector<14x128xf32>
    %257 = arith.mulf %256, %255 : vector<14x128xf32>
    %cst_158 = arith.constant 0.451862752 : f32
    %258 = vector.broadcast %cst_158 : f32 to vector<14x128xf32>
    %259 = arith.mulf %258, %253 : vector<14x128xf32>
    %260 = arith.addf %257, %259 : vector<14x128xf32>
    %c10_159 = arith.constant 10 : index
    %c0_160 = arith.constant 0 : index
    %c0_161 = arith.constant 0 : index
    %261 = vector.load %arg2[%c10_159, %c0_160, %c0_161] : memref<14x14x128xf32, #tpu.memory_space<vmem>>, vector<1x14x128xf32>
    %262 = vector.shape_cast %261 : vector<1x14x128xf32> to vector<14x128xf32>
    %263 = vector.shape_cast %260 : vector<14x128xf32> to vector<1x14x128xf32>
    tpu.vector_store %arg2[%c10_159, %c0_160, %c0_161], %263 {strides = array<i32>} : memref<14x14x128xf32, #tpu.memory_space<vmem>>, vector<1x14x128xf32>,
    %c11_162 = arith.constant 11 : index
    %c0_163 = arith.constant 0 : index
    %c0_164 = arith.constant 0 : index
    %264 = vector.load %arg1[%c11_162, %c0_163, %c0_164] : memref<16x16x128xf32, #tpu.memory_space<vmem>>, vector<1x16x128xf32>
    %265 = vector.shape_cast %264 : vector<1x16x128xf32> to vector<16x128xf32>
    %c12_165 = arith.constant 12 : index
    %c0_166 = arith.constant 0 : index
    %c0_167 = arith.constant 0 : index
    %266 = vector.load %arg1[%c12_165, %c0_166, %c0_167] : memref<16x16x128xf32, #tpu.memory_space<vmem>>, vector<1x16x128xf32>
    %267 = vector.shape_cast %266 : vector<1x16x128xf32> to vector<16x128xf32>
    %c13 = arith.constant 13 : index
    %c0_168 = arith.constant 0 : index
    %c0_169 = arith.constant 0 : index
    %268 = vector.load %arg1[%c13, %c0_168, %c0_169] : memref<16x16x128xf32, #tpu.memory_space<vmem>>, vector<1x16x128xf32>
    %269 = vector.shape_cast %268 : vector<1x16x128xf32> to vector<16x128xf32>
    %270 = arith.addf %265, %269 : vector<16x128xf32>
    %cst_170 = arith.constant 0.274068624 : f32
    %271 = vector.broadcast %cst_170 : f32 to vector<16x128xf32>
    %272 = arith.mulf %271, %270 : vector<16x128xf32>
    %cst_171 = arith.constant 0.451862752 : f32
    %273 = vector.broadcast %cst_171 : f32 to vector<16x128xf32>
    %274 = arith.mulf %273, %267 : vector<16x128xf32>
    %275 = arith.addf %272, %274 : vector<16x128xf32>
    %276 = vector.extract_strided_slice %275 {offsets = [0, 0], sizes = [14, 128], strides = [1, 1]} : vector<16x128xf32> to vector<14x128xf32>
    %277 = vector.extract_strided_slice %275 {offsets = [1, 0], sizes = [14, 128], strides = [1, 1]} : vector<16x128xf32> to vector<14x128xf32>
    %278 = vector.extract_strided_slice %275 {offsets = [2, 0], sizes = [14, 128], strides = [1, 1]} : vector<16x128xf32> to vector<14x128xf32>
    %279 = arith.addf %276, %278 : vector<14x128xf32>
    %cst_172 = arith.constant 0.274068624 : f32
    %280 = vector.broadcast %cst_172 : f32 to vector<14x128xf32>
    %281 = arith.mulf %280, %279 : vector<14x128xf32>
    %cst_173 = arith.constant 0.451862752 : f32
    %282 = vector.broadcast %cst_173 : f32 to vector<14x128xf32>
    %283 = arith.mulf %282, %277 : vector<14x128xf32>
    %284 = arith.addf %281, %283 : vector<14x128xf32>
    %c11_174 = arith.constant 11 : index
    %c0_175 = arith.constant 0 : index
    %c0_176 = arith.constant 0 : index
    %285 = vector.load %arg2[%c11_174, %c0_175, %c0_176] : memref<14x14x128xf32, #tpu.memory_space<vmem>>, vector<1x14x128xf32>
    %286 = vector.shape_cast %285 : vector<1x14x128xf32> to vector<14x128xf32>
    %287 = vector.shape_cast %284 : vector<14x128xf32> to vector<1x14x128xf32>
    tpu.vector_store %arg2[%c11_174, %c0_175, %c0_176], %287 {strides = array<i32>} : memref<14x14x128xf32, #tpu.memory_space<vmem>>, vector<1x14x128xf32>,
    %c12_177 = arith.constant 12 : index
    %c0_178 = arith.constant 0 : index
    %c0_179 = arith.constant 0 : index
    %288 = vector.load %arg1[%c12_177, %c0_178, %c0_179] : memref<16x16x128xf32, #tpu.memory_space<vmem>>, vector<1x16x128xf32>
    %289 = vector.shape_cast %288 : vector<1x16x128xf32> to vector<16x128xf32>
    %c13_180 = arith.constant 13 : index
    %c0_181 = arith.constant 0 : index
    %c0_182 = arith.constant 0 : index
    %290 = vector.load %arg1[%c13_180, %c0_181, %c0_182] : memref<16x16x128xf32, #tpu.memory_space<vmem>>, vector<1x16x128xf32>
    %291 = vector.shape_cast %290 : vector<1x16x128xf32> to vector<16x128xf32>
    %c14 = arith.constant 14 : index
    %c0_183 = arith.constant 0 : index
    %c0_184 = arith.constant 0 : index
    %292 = vector.load %arg1[%c14, %c0_183, %c0_184] : memref<16x16x128xf32, #tpu.memory_space<vmem>>, vector<1x16x128xf32>
    %293 = vector.shape_cast %292 : vector<1x16x128xf32> to vector<16x128xf32>
    %294 = arith.addf %289, %293 : vector<16x128xf32>
    %cst_185 = arith.constant 0.274068624 : f32
    %295 = vector.broadcast %cst_185 : f32 to vector<16x128xf32>
    %296 = arith.mulf %295, %294 : vector<16x128xf32>
    %cst_186 = arith.constant 0.451862752 : f32
    %297 = vector.broadcast %cst_186 : f32 to vector<16x128xf32>
    %298 = arith.mulf %297, %291 : vector<16x128xf32>
    %299 = arith.addf %296, %298 : vector<16x128xf32>
    %300 = vector.extract_strided_slice %299 {offsets = [0, 0], sizes = [14, 128], strides = [1, 1]} : vector<16x128xf32> to vector<14x128xf32>
    %301 = vector.extract_strided_slice %299 {offsets = [1, 0], sizes = [14, 128], strides = [1, 1]} : vector<16x128xf32> to vector<14x128xf32>
    %302 = vector.extract_strided_slice %299 {offsets = [2, 0], sizes = [14, 128], strides = [1, 1]} : vector<16x128xf32> to vector<14x128xf32>
    %303 = arith.addf %300, %302 : vector<14x128xf32>
    %cst_187 = arith.constant 0.274068624 : f32
    %304 = vector.broadcast %cst_187 : f32 to vector<14x128xf32>
    %305 = arith.mulf %304, %303 : vector<14x128xf32>
    %cst_188 = arith.constant 0.451862752 : f32
    %306 = vector.broadcast %cst_188 : f32 to vector<14x128xf32>
    %307 = arith.mulf %306, %301 : vector<14x128xf32>
    %308 = arith.addf %305, %307 : vector<14x128xf32>
    %c12_189 = arith.constant 12 : index
    %c0_190 = arith.constant 0 : index
    %c0_191 = arith.constant 0 : index
    %309 = vector.load %arg2[%c12_189, %c0_190, %c0_191] : memref<14x14x128xf32, #tpu.memory_space<vmem>>, vector<1x14x128xf32>
    %310 = vector.shape_cast %309 : vector<1x14x128xf32> to vector<14x128xf32>
    %311 = vector.shape_cast %308 : vector<14x128xf32> to vector<1x14x128xf32>
    tpu.vector_store %arg2[%c12_189, %c0_190, %c0_191], %311 {strides = array<i32>} : memref<14x14x128xf32, #tpu.memory_space<vmem>>, vector<1x14x128xf32>,
    %c13_192 = arith.constant 13 : index
    %c0_193 = arith.constant 0 : index
    %c0_194 = arith.constant 0 : index
    %312 = vector.load %arg1[%c13_192, %c0_193, %c0_194] : memref<16x16x128xf32, #tpu.memory_space<vmem>>, vector<1x16x128xf32>
    %313 = vector.shape_cast %312 : vector<1x16x128xf32> to vector<16x128xf32>
    %c14_195 = arith.constant 14 : index
    %c0_196 = arith.constant 0 : index
    %c0_197 = arith.constant 0 : index
    %314 = vector.load %arg1[%c14_195, %c0_196, %c0_197] : memref<16x16x128xf32, #tpu.memory_space<vmem>>, vector<1x16x128xf32>
    %315 = vector.shape_cast %314 : vector<1x16x128xf32> to vector<16x128xf32>
    %c15 = arith.constant 15 : index
    %c0_198 = arith.constant 0 : index
    %c0_199 = arith.constant 0 : index
    %316 = vector.load %arg1[%c15, %c0_198, %c0_199] : memref<16x16x128xf32, #tpu.memory_space<vmem>>, vector<1x16x128xf32>
    %317 = vector.shape_cast %316 : vector<1x16x128xf32> to vector<16x128xf32>
    %318 = arith.addf %313, %317 : vector<16x128xf32>
    %cst_200 = arith.constant 0.274068624 : f32
    %319 = vector.broadcast %cst_200 : f32 to vector<16x128xf32>
    %320 = arith.mulf %319, %318 : vector<16x128xf32>
    %cst_201 = arith.constant 0.451862752 : f32
    %321 = vector.broadcast %cst_201 : f32 to vector<16x128xf32>
    %322 = arith.mulf %321, %315 : vector<16x128xf32>
    %323 = arith.addf %320, %322 : vector<16x128xf32>
    %324 = vector.extract_strided_slice %323 {offsets = [0, 0], sizes = [14, 128], strides = [1, 1]} : vector<16x128xf32> to vector<14x128xf32>
    %325 = vector.extract_strided_slice %323 {offsets = [1, 0], sizes = [14, 128], strides = [1, 1]} : vector<16x128xf32> to vector<14x128xf32>
    %326 = vector.extract_strided_slice %323 {offsets = [2, 0], sizes = [14, 128], strides = [1, 1]} : vector<16x128xf32> to vector<14x128xf32>
    %327 = arith.addf %324, %326 : vector<14x128xf32>
    %cst_202 = arith.constant 0.274068624 : f32
    %328 = vector.broadcast %cst_202 : f32 to vector<14x128xf32>
    %329 = arith.mulf %328, %327 : vector<14x128xf32>
    %cst_203 = arith.constant 0.451862752 : f32
    %330 = vector.broadcast %cst_203 : f32 to vector<14x128xf32>
    %331 = arith.mulf %330, %325 : vector<14x128xf32>
    %332 = arith.addf %329, %331 : vector<14x128xf32>
    %c13_204 = arith.constant 13 : index
    %c0_205 = arith.constant 0 : index
    %c0_206 = arith.constant 0 : index
    %333 = vector.load %arg2[%c13_204, %c0_205, %c0_206] : memref<14x14x128xf32, #tpu.memory_space<vmem>>, vector<1x14x128xf32>
    %334 = vector.shape_cast %333 : vector<1x14x128xf32> to vector<14x128xf32>
    %335 = vector.shape_cast %332 : vector<14x128xf32> to vector<1x14x128xf32>
    tpu.vector_store %arg2[%c13_204, %c0_205, %c0_206], %335 {strides = array<i32>} : memref<14x14x128xf32, #tpu.memory_space<vmem>>, vector<1x14x128xf32>,
    return
  }
  func.func @transform_0(%arg0: i32) -> (i32, i32, i32) {
    %c0_i32 = arith.constant 0 : i32
    %c0_i32_0 = arith.constant 0 : i32
    %c0_i32_1 = arith.constant 0 : i32
    return %c0_i32, %c0_i32_0, %arg0 : i32, i32, i32
  }
  func.func @transform_1(%arg0: i32) -> (i32, i32, i32) {
    %c0_i32 = arith.constant 0 : i32
    %c0_i32_0 = arith.constant 0 : i32
    %c0_i32_1 = arith.constant 0 : i32
    return %c0_i32, %c0_i32_0, %arg0 : i32, i32, i32
  }
}

</mosaic_0001>

<bundles_post_ra>
// kernel: gaussian_blur.1
= control target key start
LH: loop header
LB: loop body
LE: loop exit
PB: predicated region body
PF: predicated region fallthrough
CT: control target
= control target key end

     0   :  { %vm26_vm0 = vcmask 1045504   ;;  %vm40_vm1 = vcmask 1046528   ;;  %s985_s0 = inlined_call_operand.vmem [shape: f32[16,16,128], index: 0, kind: input, shape index: {}]   ;;  %s986_s1 = inlined_call_operand.vmem [shape: f32[14,14,128], index: 1, kind: output, shape index: {}]  }
   0x1   :  { %v8_v0 = vld [vmem:[%s985_s0] sm:$0xff]  ;;  %v9_v1 = vld [vmem:[%s985_s0 + $0x8] sm:$0xff]  ;;  %v574_v2 = vld [vmem:[%s985_s0 + $0x10] sm:$0xff] }
   0x2   :  { %v575_v3 = vld [vmem:[%s985_s0 + $0x18] sm:$0xff]  ;;  %v576_v4 = vld [vmem:[%s985_s0 + $0x20] sm:$0xff]  ;;  %v577_v5 = vld [vmem:[%s985_s0 + $0x28] sm:$0xff]  ;;  %v20_v6 = vmul.f32 0.45186275, %v574_v2 }
   0x3   :  { %v16_v7 = vadd.f32 %v576_v4, %v8_v0  ;;  %v17_v8 = vadd.f32 %v577_v5, %v9_v1  ;;  %v21_v9 = vmul.f32 0.45186275, %v575_v3  ;;  %v582_v10 = vld [vmem:[%s985_s0 + $0x30] sm:$0xff]  ;;  %v583_v11 = vld [vmem:[%s985_s0 + $0x38] sm:$0xff]  ;;  %v61_v12 = vmul.f32 0.45186275, %v576_v4 }
   0x4   :  { %v57_v13 = vadd.f32 %v582_v10, %v574_v2  ;;  %v58_v14 = vadd.f32 %v583_v11, %v575_v3  ;;  %v62_v15 = vmul.f32 0.45186275, %v577_v5  ;;  %v719_v16 = vld [vmem:[%s985_s0 + $0x40] sm:$0xff]  ;;  %v724_v17 = vld [vmem:[%s985_s0 + $0x48] sm:$0xff]  ;;  %v101_v18 = vmul.f32 0.45186275, %v582_v10 }
   0x5   :  { %v18_v19 = vmul.f32 0.27406862, %v16_v7  ;;  %v19_v20 = vmul.f32 0.27406862, %v17_v8  ;;  %v97_v21 = vadd.f32 %v719_v16, %v576_v4  ;;  %v98_v22 = vadd.f32 %v724_v17, %v577_v5  ;;  %v731_v23 = vld [vmem:[%s985_s0 + $0x50] sm:$0xff]  ;;  %v736_v24 = vld [vmem:[%s985_s0 + $0x58] sm:$0xff] }
   0x6   :  { %v59_v25 = vmul.f32 0.27406862, %v57_v13  ;;  %v60_v26 = vmul.f32 0.27406862, %v58_v14  ;;  %v102_v27 = vmul.f32 0.45186275, %v583_v11  ;;  %v137_v28 = vadd.f32 %v731_v23, %v582_v10 }
   0x7   :  { %v22_v29 = vadd.f32 %v20_v6, %v18_v19  ;;  %v23_v30 = vadd.f32 %v21_v9, %v19_v20  ;;  %v99_v31 = vmul.f32 0.27406862, %v97_v21  ;;  %v100_v32 = vmul.f32 0.27406862, %v98_v22  ;;  %v747_v5 = vld [vmem:[%s985_s0 + $0x60] sm:$0xff]  ;;  %v607_v10 = vld [vmem:[%s985_s0 + $0x68] sm:$0xff] }
   0x8   :  { %v63_v33 = vadd.f32 %v61_v12, %v59_v25  ;;  %v64_v34 = vadd.f32 %v62_v15, %v60_v26  ;;  %v138_v35 = vadd.f32 %v736_v24, %v583_v11  ;;  %v139_v36 = vmul.f32 0.27406862, %v137_v28 }
   0x9   :  { %v27_v37 = vrot.slane %v22_v29, 2  ;;  %v28_v38 = vrot.slane %v23_v30, 2  ;;  %v36_v39 = vmul.f32 0.45186275, %v22_v29  ;;  %v37_v40 = vmul.f32 0.45186275, %v23_v30 }
   0xa   :  { %v67_v41 = vrot.slane %v63_v33, 2  ;;  %v68_v42 = vrot.slane %v64_v34, 2  ;;  %v76_v43 = vmul.f32 0.45186275, %v63_v33  ;;  %v77_v44 = vmul.f32 0.45186275, %v64_v34 }
   0xb   :  { %v29_v45 = vsel %vm26_vm0, %v27_v37, %v28_v38  ;;  %v41_v46 = vrot.slane %v36_v39, 1  ;;  %v42_v47 = vrot.slane %v37_v40, 1  ;;  %v33_v48 = vadd.f32 %v28_v38, %v23_v30 }
   0xc   :  { %v32_v49 = vadd.f32 %v29_v45, %v22_v29  ;;  %v69_v50 = vsel %vm26_vm0, %v67_v41, %v68_v42  ;;  %v80_v51 = vrot.slane %v76_v43, 1  ;;  %v81_v52 = vrot.slane %v77_v44, 1  ;;  %v788_v43 = vld [vmem:[%s985_s0 + $0x80] sm:$0xff] }
   0xd   :  { %v43_v53 = vsel %vm40_vm1, %v41_v46, %v42_v47  ;;  %v35_v54 = vmul.f32 0.27406862, %v33_v48  ;;  %v72_v55 = vadd.f32 %v69_v50, %v63_v33  ;;  %v73_v56 = vadd.f32 %v68_v42, %v64_v34 }
   0xe   :  { %v34_v57 = vmul.f32 0.27406862, %v32_v49  ;;  %v82_v58 = vsel %vm40_vm1, %v80_v51, %v81_v52  ;;  %v103_v59 = vadd.f32 %v101_v18, %v99_v31  ;;  %v104_v60 = vadd.f32 %v102_v27, %v100_v32  ;;  %v614_v31 = vld [vmem:[%s985_s0 + $0x70] sm:$0xff] }
   0xf   :  { %v47_v61 = vadd.f32 %v42_v47, %v35_v54  ;;  %v74_v62 = vmul.f32 0.27406862, %v72_v55  ;;  %v75_v63 = vmul.f32 0.27406862, %v73_v56  ;;  %v140_v0 = vmul.f32 0.27406862, %v138_v35 }
  0x10   :  { %v46_v1 = vadd.f32 %v43_v53, %v34_v57  ;;  %v107_v2 = vrot.slane %v103_v59, 2  ;;  %v108_v3 = vrot.slane %v104_v60, 2  ;;  %v116_v4 = vmul.f32 0.45186275, %v103_v59  ;;  %v800_v55 = vld [vmem:[%s985_s0 + $0x88] sm:$0xff] }
  0x11   :  { %49 = vst [vmem:[%s986_s1 + $0x8] sm:$0x3f] %v47_v61  ;;  %v85_v6 = vadd.f32 %v82_v58, %v74_v62  ;;  %v86_v7 = vadd.f32 %v81_v52, %v75_v63  ;;  %v117_v8 = vmul.f32 0.45186275, %v104_v60  ;;  %v141_v9 = vmul.f32 0.45186275, %v719_v16 }
  0x12   :  { %48 = vst [vmem:[%s986_s1] sm:$0xff] %v46_v1  ;;  %v109_v11 = vsel %vm26_vm0, %v107_v2, %v108_v3  ;;  %v120_v12 = vrot.slane %v116_v4, 1  ;;  %v113_v13 = vadd.f32 %v108_v3, %v104_v60  ;;  %v142_v14 = vmul.f32 0.45186275, %v724_v17  ;;  %v813_v3 = vld [vmem:[%s985_s0 + $0x90] sm:$0xff] }
  0x13   :  { %584 = vst [vmem:[%s986_s1 + $0x10] sm:$0xff] %v85_v6  ;;  %585 = vst [vmem:[%s986_s1 + $0x18] sm:$0x3f] %v86_v7  ;;  %v112_v15 = vadd.f32 %v109_v11, %v103_v59  ;;  %v121_v18 = vrot.slane %v117_v8, 1  ;;  %v143_v19 = vadd.f32 %v141_v9, %v139_v36  ;;  %v177_v20 = vadd.f32 %v747_v5, %v719_v16  ;;  %v778_v16 = vld [vmem:[%s985_s0 + $0x78] sm:$0xff] }
  0x14   :  { %v115_v21 = vmul.f32 0.27406862, %v113_v13  ;;  %v144_v22 = vadd.f32 %v142_v14, %v140_v0  ;;  %v178_v25 = vadd.f32 %v607_v10, %v724_v17  ;;  %v181_v26 = vmul.f32 0.45186275, %v731_v23 }
  0x15   :  { %v114_v27 = vmul.f32 0.27406862, %v112_v15  ;;  %v122_v28 = vsel %vm40_vm1, %v120_v12, %v121_v18  ;;  %v147_v29 = vrot.slane %v143_v19, 2  ;;  %v156_v30 = vmul.f32 0.45186275, %v143_v19  ;;  %v631_v15 = vld [vmem:[%s985_s0 + $0x98] sm:$0xff] }
  0x16   :  { %v126_v32 = vadd.f32 %v121_v18, %v115_v21  ;;  %v148_v33 = vrot.slane %v144_v22, 2  ;;  %v157_v34 = vmul.f32 0.45186275, %v144_v22  ;;  %v179_v35 = vmul.f32 0.27406862, %v177_v20 }
  0x17   :  { %v125_v17 = vadd.f32 %v122_v28, %v114_v27  ;;  %v160_v36 = vrot.slane %v156_v30, 1  ;;  %v180_v37 = vmul.f32 0.27406862, %v178_v25  ;;  %v182_v38 = vmul.f32 0.45186275, %v736_v24 }
  0x18   :  { %593 = vst [vmem:[%s986_s1 + $0x28] sm:$0x3f] %v126_v32  ;;  %v149_v39 = vsel %vm26_vm0, %v147_v29, %v148_v33  ;;  %v161_v40 = vrot.slane %v157_v34, 1  ;;  %v153_v41 = vadd.f32 %v148_v33, %v144_v22  ;;  %v183_v42 = vadd.f32 %v181_v26, %v179_v35  ;;  %v830_v29 = vld [vmem:[%s985_s0 + $0xa0] sm:$0xff] }
  0x19   :  { %592 = vst [vmem:[%s986_s1 + $0x20] sm:$0xff] %v125_v17  ;;  %v152_v44 = vadd.f32 %v149_v39, %v143_v19  ;;  %v184_v45 = vadd.f32 %v182_v38, %v180_v37  ;;  %v217_v46 = vadd.f32 %v614_v31, %v731_v23  ;;  %v218_v47 = vadd.f32 %v778_v16, %v736_v24 }
  0x1a   :  { %v162_v48 = vsel %vm40_vm1, %v160_v36, %v161_v40  ;;  %v155_v49 = vmul.f32 0.27406862, %v153_v41  ;;  %v187_v50 = vrot.slane %v183_v42, 2  ;;  %v196_v51 = vmul.f32 0.45186275, %v183_v42 }
  0x1b   :  { %v154_v52 = vmul.f32 0.27406862, %v152_v44  ;;  %v188_v53 = vrot.slane %v184_v45, 2  ;;  %v197_v54 = vmul.f32 0.45186275, %v184_v45  ;;  %v257_v56 = vadd.f32 %v788_v43, %v747_v5 }
  0x1c   :  { %v166_v23 = vadd.f32 %v161_v40, %v155_v49  ;;  %v200_v57 = vrot.slane %v196_v51, 1  ;;  %v219_v58 = vmul.f32 0.27406862, %v217_v46  ;;  %v220_v24 = vmul.f32 0.27406862, %v218_v47 }
  0x1d   :  { %v165_v59 = vadd.f32 %v162_v48, %v154_v52  ;;  %v189_v60 = vsel %vm26_vm0, %v187_v50, %v188_v53  ;;  %v201_v61 = vrot.slane %v197_v54, 1  ;;  %v193_v62 = vadd.f32 %v188_v53, %v184_v45  ;;  %v852_v54 = vld [vmem:[%s985_s0 + $0xb0] sm:$0xff] }
  0x1e   :  { %601 = vst [vmem:[%s986_s1 + $0x38] sm:$0x3f] %v166_v23  ;;  %v192_v63 = vadd.f32 %v189_v60, %v183_v42  ;;  %v221_v0 = vmul.f32 0.45186275, %v747_v5  ;;  %v222_v1 = vmul.f32 0.45186275, %v607_v10  ;;  %v258_v2 = vadd.f32 %v800_v55, %v607_v10 }
  0x1f   :  { %600 = vst [vmem:[%s986_s1 + $0x30] sm:$0xff] %v165_v59  ;;  %v202_v4 = vsel %vm40_vm1, %v200_v57, %v201_v61  ;;  %v195_v6 = vmul.f32 0.27406862, %v193_v62  ;;  %v259_v7 = vmul.f32 0.27406862, %v257_v56  ;;  %v297_v18 = vadd.f32 %v813_v3, %v614_v31 }
  0x20   :  { %v261_v8 = vmul.f32 0.45186275, %v614_v31  ;;  %v194_v9 = vmul.f32 0.27406862, %v192_v63  ;;  %v223_v11 = vadd.f32 %v221_v0, %v219_v58  ;;  %v224_v5 = vadd.f32 %v222_v1, %v220_v24 }
  0x21   :  { %v260_v12 = vmul.f32 0.27406862, %v258_v2  ;;  %v206_v13 = vadd.f32 %v201_v61, %v195_v6  ;;  %v262_v10 = vmul.f32 0.45186275, %v778_v16  ;;  %v298_v33 = vadd.f32 %v631_v15, %v778_v16  ;;  %v844_v16 = vld [vmem:[%s985_s0 + $0xa8] sm:$0xff]  ;;  %v866_v61 = vld [vmem:[%s985_s0 + $0xb8] sm:$0xff] }
  0x22   :  { %v263_v14 = vadd.f32 %v261_v8, %v259_v7  ;;  %v205_v19 = vadd.f32 %v202_v4, %v194_v9  ;;  %v227_v20 = vrot.slane %v223_v11, 2  ;;  %v228_v21 = vrot.slane %v224_v5, 2 }
  0x23   :  { %v236_v22 = vmul.f32 0.45186275, %v223_v11  ;;  %609 = vst [vmem:[%s986_s1 + $0x48] sm:$0x3f] %v206_v13  ;;  %v237_v25 = vmul.f32 0.45186275, %v224_v5  ;;  %v264_v26 = vadd.f32 %v262_v10, %v260_v12  ;;  %v337_v40 = vadd.f32 %v830_v29, %v788_v43 }
  0x24   :  { %v267_v27 = vrot.slane %v263_v14, 2  ;;  %v276_v28 = vmul.f32 0.45186275, %v263_v14  ;;  %608 = vst [vmem:[%s986_s1 + $0x40] sm:$0xff] %v205_v19  ;;  %v229_v30 = vsel %vm26_vm0, %v227_v20, %v228_v21  ;;  %v233_v32 = vadd.f32 %v228_v21, %v224_v5  ;;  %v881_v20 = vld [vmem:[%s985_s0 + $0xc0] sm:$0xff] }
  0x25   :  { %v240_v31 = vrot.slane %v236_v22, 1  ;;  %v232_v34 = vadd.f32 %v229_v30, %v223_v11  ;;  %v241_v35 = vrot.slane %v237_v25, 1  ;;  %v268_v17 = vrot.slane %v264_v26, 2 }
  0x26   :  { %v277_v36 = vmul.f32 0.45186275, %v264_v26  ;;  %v235_v37 = vmul.f32 0.27406862, %v233_v32  ;;  %v280_v38 = vrot.slane %v276_v28, 1  ;;  %v338_v57 = vadd.f32 %v844_v16, %v800_v55 }
  0x27   :  { %v299_v39 = vmul.f32 0.27406862, %v297_v18  ;;  %v234_v41 = vmul.f32 0.27406862, %v232_v34  ;;  %v242_v42 = vsel %vm40_vm1, %v240_v31, %v241_v35  ;;  %v269_v44 = vsel %vm26_vm0, %v267_v27, %v268_v17  ;;  %v888_v31 = vld [vmem:[%s985_s0 + $0xc8] sm:$0xff] }
  0x28   :  { %v281_v45 = vrot.slane %v277_v36, 1  ;;  %v246_v46 = vadd.f32 %v241_v35, %v235_v37  ;;  %v272_v47 = vadd.f32 %v269_v44, %v263_v14  ;;  %v273_v48 = vadd.f32 %v268_v17, %v264_v26 }
  0x29   :  { %v300_v49 = vmul.f32 0.27406862, %v298_v33  ;;  %v245_v50 = vadd.f32 %v242_v42, %v234_v41  ;;  %v301_v52 = vmul.f32 0.45186275, %v788_v43  ;;  %v302_v53 = vmul.f32 0.45186275, %v800_v55 }
  0x2a   :  { %v282_v51 = vsel %vm40_vm1, %v280_v38, %v281_v45  ;;  %617 = vst [vmem:[%s986_s1 + $0x58] sm:$0x3f] %v246_v46  ;;  %v274_v56 = vmul.f32 0.27406862, %v272_v47  ;;  %v275_v23 = vmul.f32 0.27406862, %v273_v48  ;;  %v377_v55 = vadd.f32 %v852_v54, %v813_v3 }
  0x2b   :  { %v339_v58 = vmul.f32 0.27406862, %v337_v40  ;;  %616 = vst [vmem:[%s986_s1 + $0x50] sm:$0xff] %v245_v50  ;;  %v303_v43 = vadd.f32 %v301_v52, %v299_v39  ;;  %v304_v24 = vadd.f32 %v302_v53, %v300_v49  ;;  %v341_v59 = vmul.f32 0.45186275, %v813_v3  ;;  %v907_v47 = vld [vmem:[%s985_s0 + $0xd0] sm:$0xff] }
  0x2c   :  { %v342_v60 = vmul.f32 0.45186275, %v631_v15  ;;  %v285_v62 = vadd.f32 %v282_v51, %v274_v56  ;;  %v286_v63 = vadd.f32 %v281_v45, %v275_v23  ;;  %v340_v0 = vmul.f32 0.27406862, %v338_v57  ;;  %v912_v48 = vld [vmem:[%s985_s0 + $0xd8] sm:$0xff] }
  0x2d   :  { %v307_v1 = vrot.slane %v303_v43, 2  ;;  %v308_v2 = vrot.slane %v304_v24, 2  ;;  %v316_v4 = vmul.f32 0.45186275, %v303_v43  ;;  %v317_v6 = vmul.f32 0.45186275, %v304_v24 }
  0x2e   :  { %624 = vst [vmem:[%s986_s1 + $0x60] sm:$0xff] %v285_v62  ;;  %625 = vst [vmem:[%s986_s1 + $0x68] sm:$0x3f] %v286_v63  ;;  %v343_v7 = vadd.f32 %v341_v59, %v339_v58  ;;  %v344_v8 = vadd.f32 %v342_v60, %v340_v0  ;;  %v378_v9 = vadd.f32 %v866_v61, %v631_v15  ;;  %v379_v11 = vmul.f32 0.27406862, %v377_v55 }
  0x2f   :  { %v309_v5 = vsel %vm26_vm0, %v307_v1, %v308_v2  ;;  %v320_v3 = vrot.slane %v316_v4, 1  ;;  %v321_v12 = vrot.slane %v317_v6, 1  ;;  %v313_v13 = vadd.f32 %v308_v2, %v304_v24 }
  0x30   :  { %v312_v10 = vadd.f32 %v309_v5, %v303_v43  ;;  %v347_v14 = vrot.slane %v343_v7, 2  ;;  %v348_v18 = vrot.slane %v344_v8, 2  ;;  %v356_v19 = vmul.f32 0.45186275, %v343_v7  ;;  %v670_v5 = vld [vmem:[%s985_s0 + $0xe0] sm:$0xff] }
  0x31   :  { %v322_v21 = vsel %vm40_vm1, %v320_v3, %v321_v12  ;;  %v315_v22 = vmul.f32 0.27406862, %v313_v13  ;;  %v357_v25 = vmul.f32 0.45186275, %v344_v8  ;;  %v380_v15 = vmul.f32 0.27406862, %v378_v9 }
  0x32   :  { %v314_v26 = vmul.f32 0.27406862, %v312_v10  ;;  %v349_v27 = vsel %vm26_vm0, %v347_v14, %v348_v18  ;;  %v360_v28 = vrot.slane %v356_v19, 1  ;;  %v353_v30 = vadd.f32 %v348_v18, %v344_v8  ;;  %v671_v14 = vld [vmem:[%s985_s0 + $0xe8] sm:$0xff] }
  0x33   :  { %v326_v32 = vadd.f32 %v321_v12, %v315_v22  ;;  %v352_v33 = vadd.f32 %v349_v27, %v343_v7  ;;  %v361_v34 = vrot.slane %v357_v25, 1  ;;  %v381_v35 = vmul.f32 0.45186275, %v830_v29 }
  0x34   :  { %v325_v17 = vadd.f32 %v322_v21, %v314_v26  ;;  %v355_v36 = vmul.f32 0.27406862, %v353_v30  ;;  %v382_v37 = vmul.f32 0.45186275, %v844_v16  ;;  %v417_v38 = vadd.f32 %v881_v20, %v830_v29 }
  0x35   :  { %633 = vst [vmem:[%s986_s1 + $0x78] sm:$0x3f] %v326_v32  ;;  %v354_v39 = vmul.f32 0.27406862, %v352_v33  ;;  %v362_v40 = vsel %vm40_vm1, %v360_v28, %v361_v34  ;;  %v383_v41 = vadd.f32 %v381_v35, %v379_v11  ;;  %v418_v42 = vadd.f32 %v888_v31, %v844_v16  ;;  %v679_v35 = vld [vmem:[%s985_s0 + $0xf8] sm:$0xff] }
  0x36   :  { %632 = vst [vmem:[%s986_s1 + $0x70] sm:$0xff] %v325_v17  ;;  %v366_v44 = vadd.f32 %v361_v34, %v355_v36  ;;  %v384_v45 = vadd.f32 %v382_v37, %v380_v15  ;;  %v419_v46 = vmul.f32 0.27406862, %v417_v38  ;;  %v421_v29 = vmul.f32 0.45186275, %v852_v54  ;;  %v678_v34 = vld [vmem:[%s985_s0 + $0xf0] sm:$0xff] }
  0x37   :  { %v365_v16 = vadd.f32 %v362_v40, %v354_v39  ;;  %v387_v49 = vrot.slane %v383_v41, 2  ;;  %v396_v50 = vmul.f32 0.45186275, %v383_v41  ;;  %v420_v51 = vmul.f32 0.27406862, %v418_v42 }
  0x38   :  { %641 = vst [vmem:[%s986_s1 + $0x88] sm:$0x3f] %v366_v44  ;;  %v388_v52 = vrot.slane %v384_v45, 2  ;;  %v397_v53 = vmul.f32 0.45186275, %v384_v45  ;;  %v423_v23 = vadd.f32 %v421_v29, %v419_v46  ;;  %v457_v58 = vadd.f32 %v907_v47, %v852_v54 }
  0x39   :  { %v422_v56 = vmul.f32 0.45186275, %v866_v61  ;;  %640 = vst [vmem:[%s986_s1 + $0x80] sm:$0xff] %v365_v16  ;;  %v400_v57 = vrot.slane %v396_v50, 1  ;;  %v458_v43 = vadd.f32 %v912_v48, %v866_v61  ;;  %v461_v24 = vmul.f32 0.45186275, %v881_v20 }
  0x3a   :  { %v389_v59 = vsel %vm26_vm0, %v387_v49, %v388_v52  ;;  %v401_v60 = vrot.slane %v397_v53, 1  ;;  %v393_v62 = vadd.f32 %v388_v52, %v384_v45  ;;  %v427_v55 = vrot.slane %v423_v23, 2 }
  0x3b   :  { %v424_v63 = vadd.f32 %v422_v56, %v420_v51  ;;  %v392_v0 = vadd.f32 %v389_v59, %v383_v41  ;;  %v436_v1 = vmul.f32 0.45186275, %v423_v23  ;;  %v459_v2 = vmul.f32 0.27406862, %v457_v58 }
  0x3c   :  { %v402_v4 = vsel %vm40_vm1, %v400_v57, %v401_v60  ;;  %v395_v6 = vmul.f32 0.27406862, %v393_v62  ;;  %v460_v11 = vmul.f32 0.27406862, %v458_v43  ;;  %v462_v21 = vmul.f32 0.45186275, %v888_v31 }
  0x3d   :  { %v428_v7 = vrot.slane %v424_v63, 2  ;;  %v437_v8 = vmul.f32 0.45186275, %v424_v63  ;;  %v394_v54 = vmul.f32 0.27406862, %v392_v0  ;;  %v440_v9 = vrot.slane %v436_v1, 1 }
  0x3e   :  { %v463_v61 = vadd.f32 %v461_v24, %v459_v2  ;;  %v406_v3 = vadd.f32 %v401_v60, %v395_v6  ;;  %v497_v27 = vadd.f32 %v670_v5, %v881_v20  ;;  %v464_v30 = vadd.f32 %v462_v21, %v460_v11 }
  0x3f   :  { %v429_v12 = vsel %vm26_vm0, %v427_v55, %v428_v7  ;;  %v441_v13 = vrot.slane %v437_v8, 1  ;;  %v433_v10 = vadd.f32 %v428_v7, %v424_v63  ;;  %v405_v18 = vadd.f32 %v402_v4, %v394_v54 }
  0x40   :  { %v432_v19 = vadd.f32 %v429_v12, %v423_v23  ;;  %v467_v22 = vrot.slane %v463_v61, 2  ;;  %649 = vst [vmem:[%s986_s1 + $0x98] sm:$0x3f] %v406_v3  ;;  %v476_v26 = vmul.f32 0.45186275, %v463_v61  ;;  %v498_v32 = vadd.f32 %v671_v14, %v888_v31 }
  0x41   :  { %v442_v25 = vsel %vm40_vm1, %v440_v9, %v441_v13  ;;  %v435_v15 = vmul.f32 0.27406862, %v433_v10  ;;  %648 = vst [vmem:[%s986_s1 + $0x90] sm:$0xff] %v405_v18  ;;  %v501_v33 = vmul.f32 0.45186275, %v907_v47  ;;  %v468_v39 = vrot.slane %v464_v30, 2 }
  0x42   :  { %v434_v28 = vmul.f32 0.27406862, %v432_v19  ;;  %v480_v20 = vrot.slane %v476_v26, 1  ;;  %v499_v36 = vmul.f32 0.27406862, %v497_v27  ;;  %v537_v42 = vadd.f32 %v678_v34, %v907_v47 }
  0x43   :  { %v446_v17 = vadd.f32 %v441_v13, %v435_v15  ;;  %v502_v37 = vmul.f32 0.45186275, %v912_v48  ;;  %v477_v40 = vmul.f32 0.45186275, %v464_v30  ;;  %v500_v41 = vmul.f32 0.27406862, %v498_v32 }
  0x44   :  { %v445_v38 = vadd.f32 %v442_v25, %v434_v28  ;;  %v503_v31 = vadd.f32 %v501_v33, %v499_v36  ;;  %v538_v44 = vadd.f32 %v679_v35, %v912_v48  ;;  %v541_v45 = vmul.f32 0.45186275, %v670_v5 }
  0x45   :  { %657 = vst [vmem:[%s986_s1 + $0xa8] sm:$0x3f] %v446_v17  ;;  %v469_v46 = vsel %vm26_vm0, %v467_v22, %v468_v39  ;;  %v481_v29 = vrot.slane %v477_v40, 1  ;;  %v473_v16 = vadd.f32 %v468_v39, %v464_v30  ;;  %v504_v49 = vadd.f32 %v502_v37, %v500_v41 }
  0x46   :  { %656 = vst [vmem:[%s986_s1 + $0xa0] sm:$0xff] %v445_v38  ;;  %v472_v50 = vadd.f32 %v469_v46, %v463_v61  ;;  %v507_v51 = vrot.slane %v503_v31, 2  ;;  %v516_v52 = vmul.f32 0.45186275, %v503_v31  ;;  %v539_v53 = vmul.f32 0.27406862, %v537_v42 }
  0x47   :  { %v482_v56 = vsel %vm40_vm1, %v480_v20, %v481_v29  ;;  %v475_v23 = vmul.f32 0.27406862, %v473_v16  ;;  %v508_v47 = vrot.slane %v504_v49, 2  ;;  %v517_v57 = vmul.f32 0.45186275, %v504_v49 }
  0x48   :  { %v474_v48 = vmul.f32 0.27406862, %v472_v50  ;;  %v520_v58 = vrot.slane %v516_v52, 1  ;;  %v540_v43 = vmul.f32 0.27406862, %v538_v44  ;;  %v543_v24 = vadd.f32 %v541_v45, %v539_v53 }
  0x49   :  { %v486_v59 = vadd.f32 %v481_v29, %v475_v23  ;;  %v509_v60 = vsel %vm26_vm0, %v507_v51, %v508_v47  ;;  %v521_v62 = vrot.slane %v517_v57, 1  ;;  %v513_v63 = vadd.f32 %v508_v47, %v504_v49 }
  0x4a   :  { %v485_v0 = vadd.f32 %v482_v56, %v474_v48  ;;  %v512_v55 = vadd.f32 %v509_v60, %v503_v31  ;;  %v542_v1 = vmul.f32 0.45186275, %v671_v14  ;;  %v556_v6 = vmul.f32 0.45186275, %v543_v24 }
  0x4b   :  { %665 = vst [vmem:[%s986_s1 + $0xb8] sm:$0x3f] %v486_v59  ;;  %v522_v2 = vsel %vm40_vm1, %v520_v58, %v521_v62  ;;  %v515_v4 = vmul.f32 0.27406862, %v513_v63  ;;  %v547_v54 = vrot.slane %v543_v24, 2 }
  0x4c   :  { %664 = vst [vmem:[%s986_s1 + $0xb0] sm:$0xff] %v485_v0  ;;  %v514_v7 = vmul.f32 0.27406862, %v512_v55  ;;  %v544_v8 = vadd.f32 %v542_v1, %v540_v43  ;;  %v560_v3 = vrot.slane %v556_v6, 1 }
  0x4d   :  { %v526_v9 = vadd.f32 %v521_v62, %v515_v4 }
  0x4e   :  { %v525_v11 = vadd.f32 %v522_v2, %v514_v7  ;;  %v548_v61 = vrot.slane %v544_v8, 2  ;;  %v557_v5 = vmul.f32 0.45186275, %v544_v8 }
  0x4f   :  { %673 = vst [vmem:[%s986_s1 + $0xc8] sm:$0x3f] %v526_v9 }
  0x50   :  { %672 = vst [vmem:[%s986_s1 + $0xc0] sm:$0xff] %v525_v11  ;;  %v549_v12 = vsel %vm26_vm0, %v547_v54, %v548_v61  ;;  %v561_v13 = vrot.slane %v557_v5, 1  ;;  %v553_v10 = vadd.f32 %v548_v61, %v544_v8 }
  0x51   :  { %v552_v14 = vadd.f32 %v549_v12, %v543_v24 }
  0x52   :  { %v562_v18 = vsel %vm40_vm1, %v560_v3, %v561_v13  ;;  %v555_v19 = vmul.f32 0.27406862, %v553_v10 }
  0x53   :  { %v554_v21 = vmul.f32 0.27406862, %v552_v14 }
  0x54   :  { %v566_v22 = vadd.f32 %v561_v13, %v555_v19 }
  0x55   :  { %v565_v25 = vadd.f32 %v562_v18, %v554_v21 }
  0x56   :  { %681 = vst [vmem:[%s986_s1 + $0xd8] sm:$0x3f] %v566_v22 }
  0x57   :  { %680 = vst [vmem:[%s986_s1 + $0xd0] sm:$0xff] %v565_v25 }

</bundles_post_ra>
